<compile_context>
chip_gen: v5e
topology: v5e:2x2
jax: 0.10.0
libtpu: 0.0.40
codegen_flags: <defaults>
</compile_context>

<pallas_src>
import jax
import jax.numpy as jnp
from jax.experimental import pallas as pl
from jax.experimental.pallas import tpu as pltpu

_LANE = 128
_MAX_BLOCK_BYTES = 4 * 1024 * 1024   # ~4 MiB per x block (in+out double-buffered -> ~16 MiB live)
_MIN_PALLAS_BYTES = 1 << 20          # below ~1 MiB, let XLA fuse the add instead


def _add_pe_kernel(x_ref, pe_ref, o_ref):
    # x_ref/o_ref: (TB, TC); pe_ref: (1, TC) -> broadcasts over rows.
    # Pure vld / vadd / vst stream; compute side is irrelevant (HBM-bound).
    o_ref[...] = x_ref[...] + pe_ref[...]


def make_positional_encoding(d_model: int, max_len: int = 65,
                             dtype=jnp.float32) -> jnp.ndarray:
    """Deterministic sinusoidal table, matching the PyTorch __init__."""
    pos = jnp.arange(0, max_len, dtype=jnp.float32)[:, None]        # (max_len, 1)
    _2i = jnp.arange(0, d_model, 2, dtype=jnp.float32)              # (ceil(d/2),)
    angle = pos / jnp.power(10000.0, _2i / d_model)                 # (max_len, ceil(d/2))
    enc = jnp.zeros((max_len, d_model), dtype=jnp.float32)
    enc = enc.at[:, 0::2].set(jnp.sin(angle))
    enc = enc.at[:, 1::2].set(jnp.cos(angle)[:, : d_model // 2])    # odd d_model safe
    return enc.astype(dtype)


def _round_up(n: int, m: int) -> int:
    return -(-n // m) * m


def _tiles(B: int, C: int, itemsize: int) -> tuple[int, int]:
    """Pick (tb, tc): lane-dense 128-multiple columns, dtype-aware sublane rows,
    ~_MAX_BLOCK_BYTES per block, and >=2 grid blocks when possible (v7x megacore)."""
    sub = 8 * max(1, 4 // itemsize)            # 8 f32, 16 bf16/f16, 32 int8/fp8
    budget = max(_MAX_BLOCK_BYTES // itemsize, sub * _LANE)
    c_pad = _round_up(C, _LANE)
    b_pad = _round_up(B, sub)
    # Widest 128-multiple column tile such that `sub` rows still fit the budget.
    tc_cap = max(_LANE, (budget // sub) // _LANE * _LANE)
    tc = min(c_pad, tc_cap)
    # Row tile: multiple of `sub`, filling the remaining budget.
    tb_cap = max(sub, (budget // tc) // sub * sub)
    tb = min(b_pad, tb_cap)
    # v7x has 2 TensorCores: with a single-block grid one core idles. Split the
    # column axis (else the row axis) so both cores get work; harmless on v5e/v6e.
    if pl.cdiv(C, tc) * pl.cdiv(B, tb) == 1:
        if c_pad >= 2 * _LANE:
            tc = _round_up(c_pad // 2, _LANE)
        elif b_pad >= 2 * sub:
            tb = _round_up(b_pad // 2, sub)
    return tb, tc


@jax.jit
def _positional_encoding_pallas(x: jnp.ndarray, pe: jnp.ndarray) -> jnp.ndarray:
    B, S, D = x.shape
    C = S * D
    x2 = x.reshape(B, C)        # free reshape: fold (S, D) into the lane axis
    pe2 = pe.reshape(1, C)

    itemsize = x.dtype.itemsize
    tb, tc = _tiles(B, C, itemsize)
    # Column (seq*dim) axis OUTER: pe block index constant inside the inner row loop.
    grid = (pl.cdiv(C, tc), pl.cdiv(B, tb))

    # VMEM limit from actual need: in+out double-buffered + pe double-buffered + slack.
    blk_bytes = tb * tc * itemsize
    pe_blk_bytes = 8 * tc * itemsize           # (1, tc) block, sublane-padded
    vmem_limit = int(min(max(4 * blk_bytes + 2 * pe_blk_bytes + (2 << 20), 4 << 20),
                         32 << 20))

    cost = pl.CostEstimate(
        flops=B * C,                                   # one add per element
        transcendentals=0,
        bytes_accessed=2 * B * C * itemsize + C * itemsize,
    )

    out2 = pl.pallas_call(
        _add_pe_kernel,
        out_shape=jax.ShapeDtypeStruct((B, C), x.dtype),
        grid_spec=pltpu.PrefetchScalarGridSpec(
            num_scalar_prefetch=0,
            grid=grid,
            in_specs=[
                pl.BlockSpec((tb, tc), lambda c, r: (r, c)),   # x tile
                pl.BlockSpec((1, tc), lambda c, r: (0, c)),    # pe tile (held resident)
            ],
            out_specs=pl.BlockSpec((tb, tc), lambda c, r: (r, c)),
        ),
        compiler_params=pltpu.CompilerParams(
            dimension_semantics=("parallel", "parallel"),
            vmem_limit_bytes=vmem_limit,
        ),
        cost_estimate=cost,
    )(x2, pe2)
    return out2.reshape(B, S, D)


def positional_encoding_forward(x: jnp.ndarray, encoding: jnp.ndarray,
                                *, force_pallas: bool = False) -> jnp.ndarray:
    """x: (B, S, D); encoding: (max_len, D). Returns x + encoding[:S]."""
    B, S, D = x.shape
    assert encoding.shape[0] >= S, "seq_len exceeds max_len of the encoding table"
    # Intentional: PE is cast to x.dtype (bf16 stays bf16). PyTorch would promote the
    # add to fp32 for low-precision x; exact for the fp32 path exercised below.
    pe = encoding[:S, :].astype(x.dtype)
    if not force_pallas and x.size * x.dtype.itemsize < _MIN_PALLAS_BYTES:
        # Tiny activations: launch/pipeline overhead dwarfs the HBM traffic.
        return x + pe[None, :, :]
    return _positional_encoding_pallas(x, pe)


if __name__ == "__main__":
    # 1) Small demo shape, consistent with the PyTorch module defaults.
    B, S, D = 2, 8, 32
    encoding = make_positional_encoding(D, max_len=65)
    x = jax.random.normal(jax.random.PRNGKey(0), (B, S, D), dtype=jnp.float32)
    ref = x + encoding[:S, :][None, :, :]
    out = jax.block_until_ready(positional_encoding_forward(x, encoding, force_pallas=True))
    assert out.shape == (B, S, D)
    assert jnp.allclose(out, ref, atol=1e-6), "mismatch vs reference (small shape)"

    # 2) Multi-block lane-dense path.
    B2, S2, D2 = 16, 64, 256
    enc2 = make_positional_encoding(D2, max_len=65)
    x2 = jax.random.normal(jax.random.PRNGKey(0), (B2, S2, D2), dtype=jnp.float32)
    ref2 = x2 + enc2[:S2, :][None, :, :]
    out2 = jax.block_until_ready(positional_encoding_forward(x2, enc2, force_pallas=True))
    assert jnp.allclose(out2, ref2, atol=1e-6), "mismatch vs reference (tiled shape)"

    # 3) Non-aligned shape (odd rows, seq*dim not a multiple of 128): masked edge blocks.
    B3, S3, D3 = 3, 7, 48
    enc3 = make_positional_encoding(D3, max_len=65)
    x3 = jax.random.normal(jax.random.PRNGKey(0), (B3, S3, D3), dtype=jnp.float32)
    ref3 = x3 + enc3[:S3, :][None, :, :]
    out3 = jax.block_until_ready(positional_encoding_forward(x3, enc3, force_pallas=True))
    assert jnp.allclose(out3, ref3, atol=1e-6), "mismatch vs reference (ragged shape)"

    print("KERNEL_OK")
</pallas_src>

<mosaic_0001>
module attributes {stable_mosaic.version = 11 : i64} {
  func.func @_add_pe_kernel(%arg0: i32, %arg1: i32, %arg2: memref<8x128xf32, #tpu.memory_space<vmem>>, %arg3: memref<1x128xf32, #tpu.memory_space<vmem>>, %arg4: memref<8x128xf32, #tpu.memory_space<vmem>>) attributes {dimension_semantics = [#tpu.dimension_semantics<parallel>, #tpu.dimension_semantics<parallel>], iteration_bounds = array<i64: 2, 1>, scalar_prefetch = 0 : i64, scratch_operands = 0 : i64, tpu.core_type = #tpu.core_type<tc>, window_params = [{transform_indices = @transform_0, window_bounds = array<i64: 8, 128>}, {transform_indices = @transform_1, window_bounds = array<i64: 1, 128>}, {transform_indices = @transform_2, window_bounds = array<i64: 8, 128>}]} {
    %c0 = arith.constant 0 : index
    %c0_0 = arith.constant 0 : index
    %0 = vector.load %arg2[%c0, %c0_0] : memref<8x128xf32, #tpu.memory_space<vmem>>, vector<8x128xf32>
    %c0_1 = arith.constant 0 : index
    %c0_2 = arith.constant 0 : index
    %1 = vector.load %arg3[%c0_1, %c0_2] : memref<1x128xf32, #tpu.memory_space<vmem>>, vector<1x128xf32>
    %2 = vector.broadcast %1 : vector<1x128xf32> to vector<8x128xf32>
    %3 = arith.addf %0, %2 : vector<8x128xf32>
    %c0_3 = arith.constant 0 : index
    %c0_4 = arith.constant 0 : index
    %4 = vector.load %arg4[%c0_3, %c0_4] : memref<8x128xf32, #tpu.memory_space<vmem>>, vector<8x128xf32>
    tpu.vector_store %arg4[%c0_3, %c0_4], %3 {strides = array<i32>} : memref<8x128xf32, #tpu.memory_space<vmem>>, vector<8x128xf32>,
    return
  }
  func.func @transform_0(%arg0: i32, %arg1: i32) -> (i32, i32) {
    %c0_i32 = arith.constant 0 : i32
    return %arg1, %arg0 : i32, i32
  }
  func.func @transform_1(%arg0: i32, %arg1: i32) -> (i32, i32) {
    %c0_i32 = arith.constant 0 : i32
    %c0_i32_0 = arith.constant 0 : i32
    return %c0_i32, %arg0 : i32, i32
  }
  func.func @transform_2(%arg0: i32, %arg1: i32) -> (i32, i32) {
    %c0_i32 = arith.constant 0 : i32
    return %arg1, %arg0 : i32, i32
  }
}

</mosaic_0001>

<bundles_post_ra>
// kernel: _positional_encoding_pallas.1
= control target key start
LH: loop header
LB: loop body
LE: loop exit
PB: predicated region body
PF: predicated region fallthrough
CT: control target
= control target key end

     0   :  { %s635_s9 = smov 0   ;;  %s637_s10 = smov 0   ;;  %s712_s0 = inlined_call_operand.vmem [shape: f32[2,256], index: 0, kind: input, shape index: {}]   ;;  %s713_s1 = inlined_call_operand.vmem [shape: f32[1,256], index: 1, kind: input, shape index: {}]   ;;  %s714_s2 = inlined_call_operand.vmem [shape: f32[2,256], index: 2, kind: output, shape index: {}]  }
   0x1   :  { %s639_s11 = smov 0   ;;  %s641_s12 = smov 0  }
   0x2   :  { %s643_s13 = smov 0  }
   0x3 LB: > { %s24_s14 = sadd.s32 1, %s606_s12  ;;  %s418_s15 = sadd.s32 4294967295, %s610_s13   ;;  %s610_s13 = sphi %s643_s13, %s12_s13   ;;  %s606_s12 = sphi %s641_s12, %s719_s12   ;;  %s602_s11 = sphi %s639_s11, %s718_s11   ;;  %s598_s10 = sphi %s637_s10, %s717_s10   ;;  %s594_s9 = sphi %s635_s9, %s716_s9  }
   0x4   : > { %p26_p0 = scmp.ge.s32.totalorder %s24_s14, 2  ;;  %p40_p1 = scmp.ne.s32.totalorder %s598_s10, %s594_s9 }
   0x5   : > { %p41_p2 = scmp.eq.s32.totalorder %s610_s13, 0  ;;  %p98_p4 = scmp.eq.s32.totalorder %s418_s15, 1 }
   0x6   : > { %s721_s14 = smov (%p26_p0, %s24_s14), 0  ;;  %s33_s17 = sadd.s32 1, %s598_s10 }
   0x7   : > { %p42_p3 = por %p41_p2, %p40_p1  ;;  %s29_s16 = ssub.s32 %s606_s12, %s721_s14 }
   0x8   : > { %p31_p5 = scmp.eq.s32.totalorder %s29_s16, 0  ;;  %p670_p6 = por %p98_p4, %p40_p1 }
   0x9   : > { %p421_p7 = scmp.ge.s32.totalorder %s610_s13, 2 }
   0xa   : > { %s675_s19 = scalar_select %p31_p5, %s598_s10, %s33_s17  }
   0xb   : > { %120 = sbr.rel (%p421_p7) target bundleno = 29 (0x1d), region = 16 }
  0x10   : > { %123 = sbr.rel (!%p42_p3) target bundleno = 29 (0x1d), region = 20  ;;  %s125_s20 = sand.u32 (%p42_p3), 1, %s598_s10  }
  0x11   : > { %s423_s21 = sshll.u32 (%p42_p3), %s606_s12, 1  ;;  %s422_s22 = sshll.u32 (%p42_p3), %s125_s20, 3 }
  0x12   : > { %s135_s25 = scalar_lea.vmem (%p42_p3), %s712_s0, %s423_s21   ;;  %s127_s26 = scalar_lea.vmem (%p42_p3), [#allocation2], %s422_s22  }
  0x13   : > { %s612_s27 = smov (%p42_p3), 0  }
  0x15 LB: >> { %v154_v0 = vld [vmem:[%s135_s25] sm:$0x3]  ;;  %s148_s27 = sadd.s32 1, %s614_s27   ;;  %s614_s27 = sphi %s612_s27, %s148_s27  }
  0x16   : >> { %155 = vst [vmem:[%s127_s26] sm:$0x3] %v154_v0  ;;  %p147_p8 = scmp.ge.s32.totalorder %s148_s27, 1 }
  0x18   : > { %150 = sbr.rel (!%p147_p8) target bundleno = 21 (0x15), region = 134 }
  0x1d PF: > { %p426_p9 = scmp.ge.s32.totalorder %s610_s13, 1  ;;  %p193_p10 = scmp.lt.s32.totalorder %s610_s13, 3 }
  0x1f   : > { %p194_p11 = pnand %p426_p9, %p193_p10 }
  0x20   : > { %s200_s28 = sand.u32 (!%p194_p11), 1, %s594_s9   ;;  %p226_p12 = scmp.lt.s32.totalorder (!%p194_p11), %s602_s11, 1 }
  0x21   : > { %197 = sbr.rel (%p194_p11) target bundleno = 53 (0x35), region = 58  ;;  %s427_s29 = sshll.u32 (!%p194_p11), %s200_s28, 3 }
  0x22   : > { %s202_s6 = scalar_lea.vmem (!%p194_p11), [#allocation2], %s427_s29  ;;  %s222_s7 = scalar_lea.vmem (!%p194_p11), [#allocation3], %s427_s29  }
  0x26   : > { %s227_s30 = scalar_select %p226_p12, %s602_s11, 1  ;;  %v232_v1 = vld [vmem:[%s202_s6] sm:$0xff] }
  0x27   : > { %s430_s8 = sshll.u32 (%p670_p6), %s602_s11, 1  ;;  %s616_s17 = smov (%p670_p6), 0  }
  0x28   : > { %s228_s5 = scalar_lea.vmem %s713_s1, %s227_s30  ;;  %245 = sbr.rel (!%p670_p6) target bundleno = 53 (0x35), region = 66 }
  0x29   : > { %v539_v2 = vld [vmem:[%s228_s5] ss:$0 sm:$0xff]  ;;  %s253_s16 = scalar_lea.vmem (%p670_p6), %s714_s2, %s430_s8  }
  0x2a   : > { %v237_v3 = vadd.f32 %v539_v2, %v232_v1 }
  0x2c   : > { %238 = vst [vmem:[%s222_s7] sm:$0xff] %v237_v3 }
  0x2d LB: >> { %s266_s17 = sadd.s32 1, %s618_s17   ;;  %s618_s17 = sphi %s616_s17, %s266_s17  }
  0x2e   : >> { %p265_p13 = scmp.ge.s32.totalorder %s266_s17, 1 }
  0x30   : > { %268 = sbr.rel (!%p265_p13) target bundleno = 45 (0x2d), region = 145 }
  0x33   : >> { %v272_v4 = vld [vmem:[%s222_s7] sm:$0x3] }
  0x34   : >> { %273 = vst [vmem:[%s253_s16] sm:$0x3] %v272_v4 }
  0x35 PF: > { %s12_s13 = sadd.s32 1, %s610_s13   ;;  %s716_s9 = smov %s598_s10 }
  0x36   : > { %p9_p0 = scmp.ge.s32.totalorder %s12_s13, 4   ;;  %s717_s10 = smov %s675_s19 }
  0x37   : > { %s718_s11 = smov %s606_s12  ;;  %s719_s12 = smov %s721_s14 }
  0x38   :  { %11 = sbr.rel (!%p9_p0) target bundleno = 3 (0x3), region = 156 }

</bundles_post_ra>
